<compile_context>
chip_gen: v6e
topology: v6e:2x2x1
jax: 0.10.0
libtpu: 0.0.40
codegen_flags: <defaults>
</compile_context>

<pallas_src>
import functools

import jax
import jax.numpy as jnp
from jax.experimental import pallas as pl
from jax.experimental.pallas import tpu as pltpu

LANES = 512                        # last-dim width of the flattened slab
TARGET_BLOCK_BYTES = 4 * 1024 * 1024   # ~4 MiB per input per grid step
VMEM_LIMIT_BYTES = 32 * 1024 * 1024    # 2 in x 2 bufs x 4 MiB + out, with headroom
MIN_SPLIT_ROWS = 256               # min rows per core before splitting pays off


def _num_tensorcores():
    """TensorCores sharing this chip's HBM (2 on v7x, 1 on v5e/v6e)."""
    try:
        info = pltpu.get_tpu_info()
    except Exception:
        return 2  # conservative: over-splitting on a 1-TC chip is harmless
    for attr in ("num_cores", "core_count", "num_tensorcores",
                 "tensorcores_per_chip", "cores_per_chip"):
        n = getattr(info, attr, None)
        try:
            n = int(n)
        except (TypeError, ValueError):
            continue
        if n >= 1:
            return n
    return 2


def _sq_diff_kernel(fake_ref, real_ref, out_ref, *, rows, block_rows, steps,
                    blocks_total, need_mask, acc_rows):
    c = pl.program_id(0)   # "parallel" (TensorCore) axis
    i = pl.program_id(1)   # "arbitrary" (reduction) axis

    @pl.when(i == 0)
    def _():
        out_ref[...] = jnp.zeros_like(out_ref)

    if fake_ref.dtype == jnp.bfloat16 and real_ref.dtype == jnp.bfloat16:
        # bf16 VALU (v6e/v7x): subtract packed, widen the single diff once.
        d = (real_ref[...] - fake_ref[...]).astype(jnp.float32)
    else:
        d = real_ref[...].astype(jnp.float32) - fake_ref[...].astype(jnp.float32)
    sq = d * d

    def accum(vals):
        if acc_rows == 8:
            # Fold groups of 8 rows onto full (8, LANES) vregs: plain VPU
            # adds, no sublane reduce, no masked sub-sublane stores.
            p = jnp.sum(vals.reshape(block_rows // 8, 8, LANES), axis=0)
        else:
            p = jnp.sum(vals, axis=0, keepdims=True)
        out_ref[...] += p.reshape(out_ref.shape)

    if need_mask:
        blk = c * steps + i
        last = blocks_total - 1

        # Only the last real block (partial edge) and clamped overhang blocks
        # need the iota/compare/select; keep the common path select-free.
        @pl.when(blk >= last)
        def _():
            row0 = blk * block_rows
            rid = row0 + jax.lax.broadcasted_iota(jnp.int32, (block_rows, 1), 0)
            accum(jnp.where(rid < rows, sq, 0.0))

        @pl.when(blk < last)
        def _():
            accum(sq)
    else:
        accum(sq)


def _sq_diff_sum_main(fake2d, real2d, rows):
    """Sum of (real - fake)^2 over a (rows, LANES) slab via the Pallas kernel."""
    itemsize = jnp.dtype(fake2d.dtype).itemsize
    # Keep DMA'd bytes per block roughly constant across dtypes.
    block_rows_cap = max(8, (TARGET_BLOCK_BYTES // (LANES * itemsize)) // 8 * 8)

    ncores = max(1, min(_num_tensorcores(), rows // MIN_SPLIT_ROWS))

    if ncores == 1 and rows <= block_rows_cap:
        block_rows, blocks_total, steps = rows, 1, 1
    else:
        block_rows = min(block_rows_cap, ((pl.cdiv(rows, ncores) + 7) // 8) * 8)
        blocks_total = pl.cdiv(rows, block_rows)
        steps = pl.cdiv(blocks_total, ncores)

    need_mask = (ncores * steps * block_rows) != rows
    acc_rows = 8 if block_rows % 8 == 0 else 1

    if ncores * steps == blocks_total:
        def in_idx(c, i):
            return (c * steps + i, 0)
    else:
        def in_idx(c, i):
            # Clamp so overhang grid slots re-read the last block; their
            # contribution is masked to zero inside the kernel.
            return (jnp.minimum(c * steps + i, blocks_total - 1), 0)

    kernel = functools.partial(
        _sq_diff_kernel, rows=rows, block_rows=block_rows, steps=steps,
        blocks_total=blocks_total, need_mask=need_mask, acc_rows=acc_rows)

    cost = pl.CostEstimate(
        flops=3 * rows * LANES,
        transcendentals=0,
        bytes_accessed=2 * rows * LANES * itemsize + ncores * acc_rows * LANES * 4)

    partials = pl.pallas_call(
        kernel,
        out_shape=jax.ShapeDtypeStruct((ncores, acc_rows, LANES), jnp.float32),
        grid_spec=pltpu.PrefetchScalarGridSpec(
            num_scalar_prefetch=0,
            grid=(ncores, steps),
            in_specs=[
                pl.BlockSpec((block_rows, LANES), in_idx),
                pl.BlockSpec((block_rows, LANES), in_idx),
            ],
            out_specs=pl.BlockSpec((1, acc_rows, LANES), lambda c, i: (c, 0, 0)),
        ),
        compiler_params=pltpu.CompilerParams(
            dimension_semantics=("parallel", "arbitrary"),
            allow_input_fusion=[True, True],
            vmem_limit_bytes=VMEM_LIMIT_BYTES),
        cost_estimate=cost,
    )(fake2d, real2d)

    # Final cross-sublane + cross-lane reduce, once, outside the kernel.
    return jnp.sum(partials)


def rmse_loss(fake, real):
    """sqrt(mean(|10*real - 10*fake|^2)); bilinear-resizes `fake` if needed."""
    if fake.shape != real.shape:
        # TODO(synk): bilinear resize (F.upsample) stays as jax.image.resize
        # glue (half-pixel / align_corners=False), not a Pallas kernel.
        _, _, H, W = real.shape
        fake = jax.image.resize(fake, fake.shape[:2] + (H, W),
                                method="bilinear")

    n_elems = fake.size
    if n_elems == 0:
        # torch.mean of an empty tensor is NaN; sqrt(NaN) is NaN.
        return jnp.float32(jnp.nan)

    fake_flat = fake.reshape(-1)
    real_flat = real.reshape(-1)

    n_main = (n_elems // LANES) * LANES
    rows = n_main // LANES

    total = jnp.float32(0.0)
    if rows > 0:
        # Pure metadata reshape when n_elems % LANES == 0; otherwise the slice
        # is fused into the kernel's input DMAs via allow_input_fusion.
        fake2d = fake_flat[:n_main].reshape(rows, LANES)
        real2d = real_flat[:n_main].reshape(rows, LANES)
        total = total + _sq_diff_sum_main(fake2d, real2d, rows)

    if n_main < n_elems:
        # Sub-LANES remainder (< 512 elements): plain jnp, negligible.
        dt = (real_flat[n_main:].astype(jnp.float32)
              - fake_flat[n_main:].astype(jnp.float32))
        total = total + jnp.sum(dt * dt)

    # sqrt(mean(|10r - 10f|^2)) == 10 * sqrt(mean((r - f)^2))
    return 10.0 * jnp.sqrt(total / jnp.float32(n_elems))


if __name__ == "__main__":
    key = jax.random.PRNGKey(0)
    k1, k2, k3, k4 = jax.random.split(key, 4)

    # Small NCHW inputs consistent with the module's forward.
    fake = jax.random.normal(k1, (2, 4, 16, 16), dtype=jnp.float32)
    real = jax.random.normal(k2, (2, 4, 16, 16), dtype=jnp.float32)

    loss = jax.jit(rmse_loss)(fake, real)
    jax.block_until_ready(loss)
    ref = jnp.sqrt(jnp.mean(jnp.abs(10.0 * real - 10.0 * fake) ** 2))
    assert jnp.allclose(loss, ref, rtol=1e-5, atol=1e-5), (loss, ref)

    # Second check exercising multi-block streaming, the partial edge block
    # masking and the <512-element tail (n_elems not a multiple of 512).
    fake_b = jax.random.normal(k3, (2, 4, 363, 367), dtype=jnp.float32)
    real_b = jax.random.normal(k4, (2, 4, 363, 367), dtype=jnp.float32)
    loss_b = jax.jit(rmse_loss)(fake_b, real_b)
    jax.block_until_ready(loss_b)
    ref_b = jnp.sqrt(jnp.mean(jnp.abs(10.0 * real_b - 10.0 * fake_b) ** 2))
    assert jnp.allclose(loss_b, ref_b, rtol=2e-4, atol=1e-5), (loss_b, ref_b)

    print("KERNEL_OK")
</pallas_src>

<mosaic_0001>
module attributes {stable_mosaic.version = 11 : i64} {
  func.func @_sq_diff_kernel(%arg0: i32, %arg1: i32, %arg2: memref<4x512xf32, #tpu.memory_space<vmem>>, %arg3: memref<4x512xf32, #tpu.memory_space<vmem>>, %arg4: memref<1x1x512xf32, #tpu.memory_space<vmem>>) attributes {dimension_semantics = [#tpu.dimension_semantics<parallel>, #tpu.dimension_semantics<arbitrary>], iteration_bounds = array<i64: 1, 1>, scalar_prefetch = 0 : i64, scratch_operands = 0 : i64, tpu.core_type = #tpu.core_type<tc>, window_params = [{transform_indices = @transform_0, window_bounds = array<i64: 4, 512>}, {transform_indices = @transform_1, window_bounds = array<i64: 4, 512>}, {transform_indices = @transform_2, window_bounds = array<i64: 1, 1, 512>}]} {
    %c0_i32 = arith.constant 0 : i32
    %0 = arith.cmpi eq, %arg1, %c0_i32 : i32
    %1 = arith.extui %0 : i1 to i32
    %c0_i32_0 = arith.constant 0 : i32
    %2 = arith.cmpi ne, %1, %c0_i32_0 : i32
    scf.if %2 {
      %cst_10 = arith.constant 0.000000e+00 : f32
      %13 = vector.broadcast %cst_10 : f32 to vector<1x1x512xf32>
      %c0_11 = arith.constant 0 : index
      %c0_12 = arith.constant 0 : index
      %c0_13 = arith.constant 0 : index
      %14 = vector.load %arg4[%c0_11, %c0_12, %c0_13] : memref<1x1x512xf32, #tpu.memory_space<vmem>>, vector<1x1x512xf32>
      tpu.vector_store %arg4[%c0_11, %c0_12, %c0_13], %13 {strides = array<i32>} : memref<1x1x512xf32, #tpu.memory_space<vmem>>, vector<1x1x512xf32>,
    } else {
    }
    %c0 = arith.constant 0 : index
    %c0_1 = arith.constant 0 : index
    %3 = vector.load %arg3[%c0, %c0_1] : memref<4x512xf32, #tpu.memory_space<vmem>>, vector<4x512xf32>
    %c0_2 = arith.constant 0 : index
    %c0_3 = arith.constant 0 : index
    %4 = vector.load %arg2[%c0_2, %c0_3] : memref<4x512xf32, #tpu.memory_space<vmem>>, vector<4x512xf32>
    %5 = arith.subf %3, %4 : vector<4x512xf32>
    %6 = arith.mulf %5, %5 : vector<4x512xf32>
    %cst = arith.constant dense<0.000000e+00> : vector<512xf32>
    %7 = vector.multi_reduction <add>, %6, %cst [0] : vector<4x512xf32> to vector<512xf32>
    %8 = vector.shape_cast %7 : vector<512xf32> to vector<1x512xf32>
    %c0_4 = arith.constant 0 : index
    %c0_5 = arith.constant 0 : index
    %c0_6 = arith.constant 0 : index
    %9 = vector.load %arg4[%c0_4, %c0_5, %c0_6] : memref<1x1x512xf32, #tpu.memory_space<vmem>>, vector<1x1x512xf32>
    %10 = vector.shape_cast %8 : vector<1x512xf32> to vector<1x1x512xf32>
    %11 = arith.addf %9, %10 : vector<1x1x512xf32>
    %c0_7 = arith.constant 0 : index
    %c0_8 = arith.constant 0 : index
    %c0_9 = arith.constant 0 : index
    %12 = vector.load %arg4[%c0_7, %c0_8, %c0_9] : memref<1x1x512xf32, #tpu.memory_space<vmem>>, vector<1x1x512xf32>
    tpu.vector_store %arg4[%c0_7, %c0_8, %c0_9], %11 {strides = array<i32>} : memref<1x1x512xf32, #tpu.memory_space<vmem>>, vector<1x1x512xf32>,
    return
  }
  func.func @transform_0(%arg0: i32, %arg1: i32) -> (i32, i32) {
    %c1_i32 = arith.constant 1 : i32
    %0 = arith.muli %arg0, %c1_i32 : i32
    %1 = arith.addi %0, %arg1 : i32
    %c0_i32 = arith.constant 0 : i32
    %c0_i32_0 = arith.constant 0 : i32
    return %1, %c0_i32 : i32, i32
  }
  func.func @transform_1(%arg0: i32, %arg1: i32) -> (i32, i32) {
    %c1_i32 = arith.constant 1 : i32
    %0 = arith.muli %arg0, %c1_i32 : i32
    %1 = arith.addi %0, %arg1 : i32
    %c0_i32 = arith.constant 0 : i32
    %c0_i32_0 = arith.constant 0 : i32
    return %1, %c0_i32 : i32, i32
  }
  func.func @transform_2(%arg0: i32, %arg1: i32) -> (i32, i32, i32) {
    %c0_i32 = arith.constant 0 : i32
    %c0_i32_0 = arith.constant 0 : i32
    %c0_i32_1 = arith.constant 0 : i32
    return %arg0, %c0_i32, %c0_i32_0 : i32, i32, i32
  }
}

</mosaic_0001>

<bundles_post_ra>
// kernel: rmse_loss.1
= control target key start
LH: loop header
LB: loop body
LE: loop exit
PB: predicated region body
PF: predicated region fallthrough
CT: control target
= control target key end

     0   :  { %v55_v0 = vlaneseq  ;;  %v157_v7 = vmov 0.0   ;;  %vm74_vm1 = vcmask 1043456   ;;  %v158_v25 = vmov 1966171168   ;;  %s203_s0 = inlined_call_operand.vmem [shape: f32[4,512], index: 0, kind: input, shape index: {}]   ;;  %s204_s1 = inlined_call_operand.vmem [shape: f32[4,512], index: 1, kind: input, shape index: {}]   ;;  %s205_s2 = inlined_call_operand.vmem [shape: f32[1,1,512], index: 2, kind: output, shape index: {}]  }
   0x1   :  { %v60_v1 = vld [vmem:[%s204_s1] sm:$0xff]  ;;  %v61_v2 = vld [vmem:[%s204_s1 + $0x8] sm:$0xff]  ;;  %v111_v26 = vunpack.c.l.s4 %v158_v25 }
   0x2   :  { %v62_v3 = vld [vmem:[%s203_s0] sm:$0xff]  ;;  %vm183_vm0 = vcmp.lt.s32.totalorder %v55_v0, 512  ;;  %v63_v5 = vld [vmem:[%s203_s0 + $0x8] sm:$0xff]  ;;  %v114_v36 = vshrl.u32 %v55_v0, 7 }
   0x3   :  { %v64_v6 = vsub.f32 %v60_v1, %v62_v3  ;;  %59 = vst.msk [vmem:[%s205_s2] sm:$0xf] %vm183_vm0, %v157_v7  ;;  %v65_v8 = vsub.f32 %v61_v2, %v63_v5  ;;  %v112_v35 = vunpack.c.0.s8 %v111_v26 }
   0x5   :  { %v66_v9 = vmul.f32 %v64_v6, %v64_v6  ;;  %v67_v10 = vmul.f32 %v65_v8, %v65_v8  ;;  %v115_v44 = vsub.s32 %v112_v35, %v114_v36 }
   0x7   :  { %v70_v11 = vcombine.high %v66_v9, %v66_v9  ;;  %v75_v12 = vsel %vm74_vm1, %v66_v9, 0.0  ;;  %v71_v13 = vcombine.high %v67_v10, %v67_v10  ;;  %v89_v15 = vsel %vm74_vm1, %v67_v10, 0.0 }
   0x8   :  { %v76_v14 = vrot.slane %v75_v12, 4  ;;  %v90_v17 = vrot.slane %v89_v15, 4 }
   0x9   :  { %v82_v16 = vsel %vm74_vm1, %v70_v11, 0.0  ;;  %v96_v20 = vsel %vm74_vm1, %v71_v13, 0.0 }
   0xa   :  { %v77_v18 = vadd.f32 %v76_v14, %v75_v12  ;;  %v83_v19 = vrot.slane %v82_v16, 4  ;;  %v91_v21 = vadd.f32 %v90_v17, %v89_v15  ;;  %v97_v22 = vrot.slane %v96_v20, 4  ;;  %v103_v51 = vld [vmem:[%s205_s2] sm:$0xf] }
   0xc   :  { %v78_v23 = vrot.slane %v77_v18, 2  ;;  %v84_v24 = vadd.f32 %v83_v19, %v82_v16  ;;  %v92_v27 = vrot.slane %v91_v21, 2  ;;  %v98_v28 = vadd.f32 %v97_v22, %v96_v20 }
   0xe   :  { %v79_v29 = vadd.f32 %v78_v23, %v77_v18  ;;  %v85_v30 = vrot.slane %v84_v24, 2  ;;  %v93_v31 = vadd.f32 %v92_v27, %v91_v21  ;;  %v99_v32 = vrot.slane %v98_v28, 2 }
  0x10   :  { %v80_v33 = vrot.slane %v79_v29, 1  ;;  %v86_v34 = vadd.f32 %v85_v30, %v84_v24  ;;  %v94_v37 = vrot.slane %v93_v31, 1  ;;  %v100_v38 = vadd.f32 %v99_v32, %v98_v28 }
  0x12   :  { %v81_v39 = vadd.f32 %v80_v33, %v79_v29  ;;  %v87_v40 = vrot.slane %v86_v34, 1  ;;  %v95_v41 = vadd.f32 %v94_v37, %v93_v31  ;;  %v101_v42 = vrot.slane %v100_v38, 1 }
  0x14   :  { %v88_v43 = vadd.f32 %v87_v40, %v86_v34  ;;  %v102_v45 = vadd.f32 %v101_v42, %v100_v38 }
  0x16   :  { %v108_v46 = vcombine.low %v81_v39, %v88_v43  ;;  %v109_v47 = vcombine.low %v95_v41, %v102_v45 }
  0x18   :  { %v116_v48 = vrot.slane %v108_v46, %v115_v44  ;;  %v123_v49 = vrot.slane %v109_v47, %v115_v44 }
  0x1a   :  { %v124_v50 = vcombine.low %v116_v48, %v123_v49 }
  0x1c   :  { %v131_v52 = vrot.slane %v124_v50, %v115_v44 }
  0x1e   :  { %v133_v53 = vadd.f32 %v131_v52, %v103_v51 }
  0x20   :  { %138 = vst.msk [vmem:[%s205_s2] sm:$0xf] %vm183_vm0, %v133_v53 }

</bundles_post_ra>
